<compile_context>
chip_gen: v7x
topology: tpu7x:2x2x1
jax: 0.10.0
libtpu: 0.0.40
codegen_flags: <defaults>
</compile_context>

<pallas_src>
import functools

import jax
import jax.numpy as jnp
from jax.experimental import pallas as pl
from jax.experimental.pallas import tpu as pltpu


def _round_up(x, m):
    return ((x + m - 1) // m) * m


def _generator_kernel(z_ref, w1_ref, b1_ref, w2_ref, b2_ref, out_ref, *, bf16_tanh):
    # z:  (TILE_N, LATENT) bf16   w1: (LATENT, HIDDEN) bf16   b1: (1, HIDDEN) f32
    # w2: (HIDDEN, OUT) bf16      b2: (1, OUT) f32            out: (TILE_N, OUT) bf16
    z = z_ref[...]
    # Layer 1: bf16 operands, f32 accumulation on the MXU.
    h = jnp.dot(z, w1_ref[...], preferred_element_type=jnp.float32) + b1_ref[...]
    # LeakyReLU(0.2) in f32 on the VPU.
    h = jnp.where(h > 0, h, 0.2 * h)
    # Layer 2: cast activation back to bf16 for the MXU, accumulate in f32.
    o = jnp.dot(h.astype(jnp.bfloat16), w2_ref[...],
                preferred_element_type=jnp.float32) + b2_ref[...]
    if bf16_tanh:
        # v6e/v7x: bf16 EUP path — halves EUP pushes in the epilogue.
        out_ref[...] = jnp.tanh(o.astype(jnp.bfloat16)).astype(out_ref.dtype)
    else:
        # v5e and older: f32 tanh (no bf16 EUP), downcast only on the store.
        out_ref[...] = jnp.tanh(o).astype(out_ref.dtype)


@functools.partial(jax.jit, static_argnames=("tile_n", "bf16_tanh", "out_dtype"))
def _generator_forward_impl(z, w1, b1, w2, b2, *, tile_n, bf16_tanh, out_dtype):
    n, latent = z.shape
    hidden = w1.shape[1]
    out_dim = w2.shape[1]
    assert out_dim == 28 * 28

    # Effective batch tile: multiple of 8 (sublane rule) unless the whole batch
    # is smaller than 8 rows (then the block equals the full dim).
    n_pad8 = _round_up(n, 8)
    eff_tile = min(tile_n, n_pad8)
    eff_tile = max(8, (eff_tile // 8) * 8)
    if n < 8:
        eff_tile = n
    elif pl.cdiv(n, eff_tile) < 2 and n_pad8 >= 16:
        # Guarantee >= 2 grid steps so v7x's two TensorCores both get work.
        eff_tile = max(8, _round_up(pl.cdiv(n_pad8, 2), 8))
    num_tiles = pl.cdiv(n, eff_tile)

    # bf16 matmul operands (MXU-native, halves weight/z HBM traffic); biases
    # stay f32 for the f32 epilogue.
    z_bf = z.astype(jnp.bfloat16)
    w1_bf = w1.astype(jnp.bfloat16)
    w2_bf = w2.astype(jnp.bfloat16)
    b1_f32 = b1.astype(jnp.float32)
    b2_f32 = b2.astype(jnp.float32)

    out_itemsize = jnp.dtype(out_dtype).itemsize
    cost = pl.CostEstimate(
        flops=2 * n * (latent * hidden + hidden * out_dim),
        transcendentals=n * out_dim,
        bytes_accessed=(z_bf.size * 2 + w1_bf.size * 2 + w2_bf.size * 2
                        + b1_f32.size * 4 + b2_f32.size * 4
                        + n * out_dim * out_itemsize),
    )

    kernel = functools.partial(_generator_kernel, bf16_tanh=bf16_tanh)

    flat = pl.pallas_call(
        kernel,
        out_shape=jax.ShapeDtypeStruct((n, out_dim), out_dtype),
        grid=(num_tiles,),
        in_specs=[
            # Batch-tiled latent codes (double-buffered per grid step); the
            # boundary block (if n % eff_tile != 0) is masked by Pallas.
            pl.BlockSpec((eff_tile, latent), lambda i: (i, 0)),
            # Weights / biases: constant index_map -> VMEM-resident, no re-DMA.
            pl.BlockSpec((latent, hidden), lambda i: (0, 0)),
            pl.BlockSpec((1, hidden), lambda i: (0, 0)),
            pl.BlockSpec((hidden, out_dim), lambda i: (0, 0)),
            pl.BlockSpec((1, out_dim), lambda i: (0, 0)),
        ],
        out_specs=pl.BlockSpec((eff_tile, out_dim), lambda i: (i, 0)),
        compiler_params=pltpu.CompilerParams(
            dimension_semantics=("parallel",),
        ),
        cost_estimate=cost,
    )(z_bf, w1_bf, b1_f32, w2_bf, b2_f32)

    # Glue: equivalent of `output.view(output.size(0), 1, 28, 28)`.  Kept
    # outside the kernel so the kernel's stores remain lane-dense (784 minor);
    # this reshape is layout-compatible (no data movement).
    return flat.reshape(n, 1, 28, 28)


def _bf16_tanh_supported():
    """bf16 EUP path exists on v6e/v7x; keep f32 tanh elsewhere (v5e etc.)."""
    try:
        kind = jax.devices()[0].device_kind.lower()
    except Exception:
        return False
    return ("v6" in kind) or ("v7" in kind)


def generator_forward(z, w1, b1, w2, b2, *, tile_n=2048, out_dtype=jnp.bfloat16):
    """MLP generator hot path as a batch-tiled Pallas kernel.

    Args:
      z:  (N, LATENT) float32 latent codes.
      w1: (LATENT, HIDDEN), b1: (1, HIDDEN)
      w2: (HIDDEN, 784),    b2: (1, 784)
      tile_n: max rows of the batch processed per grid step.
      out_dtype: dtype of the stored images (bf16 halves writeback traffic;
        tanh output lies in (-1, 1) so bf16 is ~4e-3 relative error).
    Returns:
      (N, 1, 28, 28) images in NCHW, values in (-1, 1), dtype `out_dtype`.
    """
    return _generator_forward_impl(
        z, w1, b1, w2, b2,
        tile_n=tile_n, bf16_tanh=_bf16_tanh_supported(), out_dtype=out_dtype)


def init_params(key, latent, hidden, out_dim):
    """Deterministic synthetic parameter init (Kaiming-ish scaling)."""
    k1, k2, k3, k4 = jax.random.split(key, 4)
    w1 = jax.random.normal(k1, (latent, hidden), jnp.float32) * (1.0 / jnp.sqrt(latent))
    b1 = jax.random.normal(k2, (1, hidden), jnp.float32) * 0.01
    w2 = jax.random.normal(k3, (hidden, out_dim), jnp.float32) * (1.0 / jnp.sqrt(hidden))
    b2 = jax.random.normal(k4, (1, out_dim), jnp.float32) * 0.01
    return w1, b1, w2, b2


if __name__ == "__main__":
    N, LATENT, HIDDEN, OUT = 8, 32, 128, 28 * 28

    key = jax.random.PRNGKey(0)
    kz, kp = jax.random.split(key)
    z = jax.random.normal(kz, (N, LATENT), jnp.float32)
    w1, b1, w2, b2 = init_params(kp, LATENT, HIDDEN, OUT)

    out = generator_forward(z, w1, b1, w2, b2)
    out = jax.block_until_ready(out)
    assert out.shape == (N, 1, 28, 28)

    # Reference check in plain JAX with matched bf16 matmul-operand precision.
    h_ref = (z.astype(jnp.bfloat16).astype(jnp.float32)
             @ w1.astype(jnp.bfloat16).astype(jnp.float32)) + b1
    h_ref = jnp.where(h_ref > 0, h_ref, 0.2 * h_ref)
    o_ref = (h_ref.astype(jnp.bfloat16).astype(jnp.float32)
             @ w2.astype(jnp.bfloat16).astype(jnp.float32)) + b2
    ref = jnp.tanh(o_ref).reshape(N, 1, 28, 28)

    # bf16 matmul operands + bf16 tanh/store -> ~1e-2-level agreement budget.
    err = jnp.max(jnp.abs(out.astype(jnp.float32) - ref))
    assert err < 3e-2, err

    print("KERNEL_OK")
</pallas_src>

<mosaic_0001>
module attributes {stable_mosaic.version = 11 : i64} {
  func.func @_generator_kernel(%arg0: i32, %arg1: memref<8x32xbf16, #tpu.memory_space<vmem>>, %arg2: memref<32x128xbf16, #tpu.memory_space<vmem>>, %arg3: memref<1x128xf32, #tpu.memory_space<vmem>>, %arg4: memref<128x784xbf16, #tpu.memory_space<vmem>>, %arg5: memref<1x784xf32, #tpu.memory_space<vmem>>, %arg6: memref<8x784xbf16, #tpu.memory_space<vmem>>) attributes {dimension_semantics = [#tpu.dimension_semantics<parallel>], iteration_bounds = array<i64: 1>, scalar_prefetch = 0 : i64, scratch_operands = 0 : i64, tpu.core_type = #tpu.core_type<tc>, window_params = [{transform_indices = @transform_0, window_bounds = array<i64: 8, 32>}, {pipeline_mode = #tpu.pipeline_mode<synchronous>, transform_indices = @transform_1, window_bounds = array<i64: 32, 128>}, {pipeline_mode = #tpu.pipeline_mode<synchronous>, transform_indices = @transform_2, window_bounds = array<i64: 1, 128>}, {pipeline_mode = #tpu.pipeline_mode<synchronous>, transform_indices = @transform_3, window_bounds = array<i64: 128, 784>}, {pipeline_mode = #tpu.pipeline_mode<synchronous>, transform_indices = @transform_4, window_bounds = array<i64: 1, 784>}, {transform_indices = @transform_5, window_bounds = array<i64: 8, 784>}]} {
    %c0 = arith.constant 0 : index
    %c0_0 = arith.constant 0 : index
    %0 = vector.load %arg1[%c0, %c0_0] : memref<8x32xbf16, #tpu.memory_space<vmem>>, vector<8x32xbf16>
    %c0_1 = arith.constant 0 : index
    %c0_2 = arith.constant 0 : index
    %1 = vector.load %arg2[%c0_1, %c0_2] : memref<32x128xbf16, #tpu.memory_space<vmem>>, vector<32x128xbf16>
    %cst = arith.constant dense<0.000000e+00> : vector<8x128xf32>
    %2 = tpu.matmul %0, %1, %cst {dimension_numbers = #tpu.dot_dimension_numbers<[1], [0], [0], [1], [0, 0, 1, 1], [], []>} : vector<8x32xbf16>, vector<32x128xbf16>, vector<8x128xf32> -> vector<8x128xf32>
    %c0_3 = arith.constant 0 : index
    %c0_4 = arith.constant 0 : index
    %3 = vector.load %arg3[%c0_3, %c0_4] : memref<1x128xf32, #tpu.memory_space<vmem>>, vector<1x128xf32>
    %4 = vector.broadcast %3 : vector<1x128xf32> to vector<8x128xf32>
    %5 = arith.addf %2, %4 : vector<8x128xf32>
    %cst_5 = arith.constant 0.000000e+00 : f32
    %6 = vector.broadcast %cst_5 : f32 to vector<8x128xf32>
    %7 = arith.cmpf ogt, %5, %6 : vector<8x128xf32>
    %cst_6 = arith.constant 2.000000e-01 : f32
    %8 = vector.broadcast %cst_6 : f32 to vector<8x128xf32>
    %9 = arith.mulf %8, %5 : vector<8x128xf32>
    %10 = arith.select %7, %5, %9 : vector<8x128xi1>, vector<8x128xf32>
    %11 = arith.truncf %10 : vector<8x128xf32> to vector<8x128xbf16>
    %c0_7 = arith.constant 0 : index
    %c0_8 = arith.constant 0 : index
    %12 = vector.load %arg4[%c0_7, %c0_8] : memref<128x784xbf16, #tpu.memory_space<vmem>>, vector<128x784xbf16>
    %cst_9 = arith.constant dense<0.000000e+00> : vector<8x784xf32>
    %13 = tpu.matmul %11, %12, %cst_9 {dimension_numbers = #tpu.dot_dimension_numbers<[1], [0], [0], [1], [0, 0, 1, 1], [], []>} : vector<8x128xbf16>, vector<128x784xbf16>, vector<8x784xf32> -> vector<8x784xf32>
    %c0_10 = arith.constant 0 : index
    %c0_11 = arith.constant 0 : index
    %14 = vector.load %arg5[%c0_10, %c0_11] : memref<1x784xf32, #tpu.memory_space<vmem>>, vector<1x784xf32>
    %15 = vector.broadcast %14 : vector<1x784xf32> to vector<8x784xf32>
    %16 = arith.addf %13, %15 : vector<8x784xf32>
    %17 = math.tanh %16 : vector<8x784xf32>
    %18 = arith.truncf %17 : vector<8x784xf32> to vector<8x784xbf16>
    %c0_12 = arith.constant 0 : index
    %c0_13 = arith.constant 0 : index
    %19 = vector.load %arg6[%c0_12, %c0_13] : memref<8x784xbf16, #tpu.memory_space<vmem>>, vector<8x784xbf16>
    tpu.vector_store %arg6[%c0_12, %c0_13], %18 {strides = array<i32>} : memref<8x784xbf16, #tpu.memory_space<vmem>>, vector<8x784xbf16>,
    return
  }
  func.func @transform_0(%arg0: i32) -> (i32, i32) {
    %c0_i32 = arith.constant 0 : i32
    %c0_i32_0 = arith.constant 0 : i32
    return %arg0, %c0_i32 : i32, i32
  }
  func.func @transform_1(%arg0: i32) -> (i32, i32) {
    %c0_i32 = arith.constant 0 : i32
    %c0_i32_0 = arith.constant 0 : i32
    %c0_i32_1 = arith.constant 0 : i32
    return %c0_i32, %c0_i32_0 : i32, i32
  }
  func.func @transform_2(%arg0: i32) -> (i32, i32) {
    %c0_i32 = arith.constant 0 : i32
    %c0_i32_0 = arith.constant 0 : i32
    %c0_i32_1 = arith.constant 0 : i32
    return %c0_i32, %c0_i32_0 : i32, i32
  }
  func.func @transform_3(%arg0: i32) -> (i32, i32) {
    %c0_i32 = arith.constant 0 : i32
    %c0_i32_0 = arith.constant 0 : i32
    %c0_i32_1 = arith.constant 0 : i32
    return %c0_i32, %c0_i32_0 : i32, i32
  }
  func.func @transform_4(%arg0: i32) -> (i32, i32) {
    %c0_i32 = arith.constant 0 : i32
    %c0_i32_0 = arith.constant 0 : i32
    %c0_i32_1 = arith.constant 0 : i32
    return %c0_i32, %c0_i32_0 : i32, i32
  }
  func.func @transform_5(%arg0: i32) -> (i32, i32) {
    %c0_i32 = arith.constant 0 : i32
    %c0_i32_0 = arith.constant 0 : i32
    return %arg0, %c0_i32 : i32, i32
  }
}

</mosaic_0001>

<bundles_post_ra>
// kernel: _generator_forward_impl.1
= control target key start
LH: loop header
LB: loop body
LE: loop exit
PB: predicated region body
PF: predicated region fallthrough
CT: control target
= control target key end

     0   :  { %v897_v0 = vmov 0.0   ;;  %vm898_vm0 = vmmov 0   ;;  %vm45_vm1 = vcmask 261120   ;;  %v899_v37 = vmov 0   ;;  %s1139_s1 = inlined_call_operand.vmem [shape: bf16[32,128], index: 1, kind: input, shape index: {}]   ;;  %s1140_s3 = inlined_call_operand.vmem [shape: bf16[128,784], index: 3, kind: input, shape index: {}]   ;;  %s1141_s0 = inlined_call_operand.vmem [shape: bf16[8,32], index: 0, kind: input, shape index: {}]   ;;  %s1142_s2 = inlined_call_operand.vmem [shape: f32[1,128], index: 2, kind: input, shape index: {}]   ;;  %s1143_s4 = inlined_call_operand.vmem [shape: f32[1,784], index: 4, kind: input, shape index: {}]   ;;  %s1144_s5 = inlined_call_operand.vmem [shape: bf16[8,784], index: 5, kind: output, shape index: {}]  }
   0x1   :  { %770 = vmatprep.subr.bf16.mxu0 %v897_v0  ;;  %v801_v1 = vld [vmem:[%s1139_s1] sm:$0xff]   ;;  %774 = vmatprep.mubr.msk.bf16.mxu0 %vm898_vm0, %v897_v0  ;;  %v802_v2 = vld [vmem:[%s1139_s1 + $0x8] sm:$0xff]   ;;  %v809_v7 = vld [vmem:[%s1140_s3 + $0x3c] ss:$28 sps:$4 sm:$0xff]   ;;  %vm684_vm3 = vcmask 125952  }
   0x2   :  { %771 = vmatpush3.bf16.msra.mxu0 %v801_v1  ;;  %v803_v3 = vld [vmem:[%s1140_s3 + $0x4] ss:$28 sps:$4 sm:$0xff]   ;;  %v807_v5 = vld [vmem:[%s1140_s3 + $0xc] ss:$28 sps:$4 sm:$0xff]   ;;  %v814_v10 = vld [vmem:[%s1140_s3 + $0x38] ss:$28 sps:$4 sm:$0xff]   ;;  %514 = vmatprep.mubr.bf16.mxu1 %v899_v37 }
   0x3   :  { %772 = vmatprep.subr.bf16.mxu0 %v897_v0  ;;  %v21_v4 = vld [vmem:[%s1141_s0] sm:$0xf]  ;;  %482 = vmatprep.subr.bf16.mxu1 %v803_v3  ;;  %v805_v8 = vld [vmem:[%s1140_s3 + $0x8] ss:$28 sps:$4 sm:$0xff]   ;;  %v815_v11 = vld [vmem:[%s1140_s3 + $0x74] ss:$28 sps:$4 sm:$0xff]  }
   0x4   :  { %v808_v6 = vld [vmem:[%s1140_s3] ss:$28 sps:$4 sm:$0xff]   ;;  %v820_v14 = vld [vmem:[%s1140_s3 + $0x70] ss:$28 sps:$4 sm:$0xff]   ;;  %v817_v16 = vld [vmem:[%s1140_s3 + $0x78] ss:$28 sps:$4 sm:$0xff]  }
   0x5   :  { %483 = vmatpush1.bf16.msra.mxu1 %v808_v6  ;;  %v813_v9 = vld [vmem:[%s1140_s3 + $0x44] ss:$28 sps:$4 sm:$0xff]   ;;  %v819_v13 = vld [vmem:[%s1140_s3 + $0x7c] ss:$28 sps:$4 sm:$0xff]   ;;  %v821_v15 = vld [vmem:[%s1140_s3 + $0xac] ss:$28 sps:$4 sm:$0xff]  }
   0x6   :  { %773 = vmatpush3.bf16.msra.mxu0 %v802_v2  ;;  %484 = vmatprep.subr.bf16.mxu1 %v809_v7  ;;  %v811_v12 = vld [vmem:[%s1140_s3 + $0x40] ss:$28 sps:$4 sm:$0xff]   ;;  %v826_v17 = vld [vmem:[%s1140_s3 + $0xa8] ss:$28 sps:$4 sm:$0xff]   ;;  %v825_v18 = vld [vmem:[%s1140_s3 + $0xb4] ss:$28 sps:$4 sm:$0xff]   ;;  %v159_v7 = vlaneseq }
   0x7   :  { %523 = vmatprep.subr.bf16.mxu0 %v807_v5  ;;  %v827_v19 = vld [vmem:[%s1140_s3 + $0xe4] ss:$28 sps:$4 sm:$0xff]   ;;  %v823_v20 = vld [vmem:[%s1140_s3 + $0xb0] ss:$28 sps:$4 sm:$0xff]   ;;  %v833_v23 = vld [vmem:[%s1140_s3 + $0x11c] ss:$28 sps:$4 sm:$0xff]  }
   0x8   :  { %v831_v21 = vld [vmem:[%s1140_s3 + $0xec] ss:$28 sps:$4 sm:$0xff]   ;;  %v832_v22 = vld [vmem:[%s1140_s3 + $0xe0] ss:$28 sps:$4 sm:$0xff]   ;;  %v838_v25 = vld [vmem:[%s1140_s3 + $0x118] ss:$28 sps:$4 sm:$0xff]  }
   0x9   :  { %775 = vmatmul.mubr.msk.bf16.vlgmr.msra.gmra.mrb[0].mxu0 %vm45_vm1, %v21_v4  ;;  %485 = vmatpush1.bf16.msra.mxu1 %v814_v10  ;;  %v829_v24 = vld [vmem:[%s1140_s3 + $0xe8] ss:$28 sps:$4 sm:$0xff]   ;;  %v839_v27 = vld [vmem:[%s1140_s3 + $0x154] ss:$28 sps:$4 sm:$0xff]   ;;  %v835_v28 = vld [vmem:[%s1140_s3 + $0x120] ss:$28 sps:$4 sm:$0xff]  }
   0xa   :  { %524 = vmatpush1.bf16.msra.mxu0 %v805_v8  ;;  %486 = vmatprep.subr.bf16.mxu1 %v815_v11  ;;  %v837_v26 = vld [vmem:[%s1140_s3 + $0x124] ss:$28 sps:$4 sm:$0xff]   ;;  %v843_v29 = vld [vmem:[%s1140_s3 + $0x15c] ss:$28 sps:$4 sm:$0xff]   ;;  %v844_v31 = vld [vmem:[%s1140_s3 + $0x150] ss:$28 sps:$4 sm:$0xff]  }
   0xb   :  { %525 = vmatprep.subr.bf16.mxu0 %v813_v9  ;;  %v841_v30 = vld [vmem:[%s1140_s3 + $0x158] ss:$28 sps:$4 sm:$0xff]   ;;  %v845_v32 = vld [vmem:[%s1140_s3 + $0x18c] ss:$28 sps:$4 sm:$0xff]   ;;  %555 = vmatprep.mubr.bf16.mxu0 %v899_v37  ;;  %v690_v38 = vld [vmem:[%s1142_s2] ss:$0 sm:$0xff] }
   0xc   :  { %v849_v33 = vld [vmem:[%s1140_s3 + $0x194] ss:$28 sps:$4 sm:$0xff]   ;;  %v850_v35 = vld [vmem:[%s1140_s3 + $0x188] ss:$28 sps:$4 sm:$0xff]   ;;  %v859_v53 = vld [vmem:[%s1140_s3 + $0x80] ss:$28 sps:$4 sm:$0xff]  }
   0xd   :  { %487 = vmatpush1.bf16.msra.mxu1 %v820_v14  ;;  %v847_v34 = vld [vmem:[%s1140_s3 + $0x190] ss:$28 sps:$4 sm:$0xff]   ;;  %v854_v47 = vld [vmem:[%s1140_s3 + $0x18] ss:$28 sps:$4 sm:$0xff]   ;;  %v855_v50 = vld [vmem:[%s1140_s3 + $0x48] ss:$28 sps:$4 sm:$0xff]  }
   0xe   :  { %526 = vmatpush1.bf16.msra.mxu0 %v811_v12  ;;  %488 = vmatprep.subr.bf16.mxu1 %v821_v15  ;;  %v853_v36 = vld [vmem:[%s1140_s3 + $0x14] ss:$28 sps:$4 sm:$0xff]   ;;  %v857_v49 = vld [vmem:[%s1140_s3 + $0x4c] ss:$28 sps:$4 sm:$0xff]   ;;  %v861_v52 = vld [vmem:[%s1140_s3 + $0x84] ss:$28 sps:$4 sm:$0xff]  }
   0xf   :  { %527 = vmatprep.subr.bf16.mxu0 %v819_v13  ;;  %v851_v46 = vld [vmem:[%s1140_s3 + $0x10] ss:$28 sps:$4 sm:$0xff]   ;;  %v862_v54 = vld [vmem:[%s1140_s3 + $0x88] ss:$28 sps:$4 sm:$0xff]   ;;  %v865_v55 = vld [vmem:[%s1140_s3 + $0xbc] ss:$28 sps:$4 sm:$0xff]  }
  0x10   :  { %v858_v51 = vld [vmem:[%s1140_s3 + $0x50] ss:$28 sps:$4 sm:$0xff]   ;;  %v863_v56 = vld [vmem:[%s1140_s3 + $0xb8] ss:$28 sps:$4 sm:$0xff]   ;;  %v866_v57 = vld [vmem:[%s1140_s3 + $0xc0] ss:$28 sps:$4 sm:$0xff]  }
  0x11   :  { %489 = vmatpush1.bf16.msra.mxu1 %v826_v17  ;;  %v869_v58 = vld [vmem:[%s1140_s3 + $0xf4] ss:$28 sps:$4 sm:$0xff]   ;;  %v873_v61 = vld [vmem:[%s1140_s3 + $0x12c] ss:$28 sps:$4 sm:$0xff]   ;;  %v877_v1 = vld [vmem:[%s1140_s3 + $0x164] ss:$28 sps:$4 sm:$0xff]  }
  0x12   :  { %528 = vmatpush1.bf16.msra.mxu0 %v817_v16  ;;  %490 = vmatprep.subr.bf16.mxu1 %v827_v19  ;;  %v867_v59 = vld [vmem:[%s1140_s3 + $0xf0] ss:$28 sps:$4 sm:$0xff]   ;;  %v870_v60 = vld [vmem:[%s1140_s3 + $0xf8] ss:$28 sps:$4 sm:$0xff]   ;;  %v871_v62 = vld [vmem:[%s1140_s3 + $0x128] ss:$28 sps:$4 sm:$0xff]  }
  0x13   :  { %529 = vmatprep.subr.bf16.mxu0 %v825_v18  ;;  %v874_v63 = vld [vmem:[%s1140_s3 + $0x130] ss:$28 sps:$4 sm:$0xff]   ;;  %v875_v2 = vld [vmem:[%s1140_s3 + $0x160] ss:$28 sps:$4 sm:$0xff]   ;;  %v878_v3 = vld [vmem:[%s1140_s3 + $0x168] ss:$28 sps:$4 sm:$0xff]  }
  0x14   :  { %v881_v4 = vld [vmem:[%s1140_s3 + $0x19c] ss:$28 sps:$4 sm:$0xff]   ;;  %v160_v8 = vshrl.u32 %v159_v7, 7  ;;  %v157_v11 = vld [vmem:[%s1143_s4] sm:$0x7f] }
  0x15   :  { %491 = vmatpush1.bf16.msra.mxu1 %v832_v22  ;;  %v879_v5 = vld [vmem:[%s1140_s3 + $0x198] ss:$28 sps:$4 sm:$0xff]   ;;  %v882_v6 = vld [vmem:[%s1140_s3 + $0x1a0] ss:$28 sps:$4 sm:$0xff]  }
  0x16   :  { %530 = vmatpush1.bf16.msra.mxu0 %v823_v20  ;;  %492 = vmatprep.subr.bf16.mxu1 %v833_v23  ;;  %v161_v9 = vsub.s32 0, %v160_v8  ;;  %v169_v10 = vsub.s32 2, %v160_v8  ;;  %v165_v12 = vsub.s32 1, %v160_v8  ;;  %v173_v13 = vsub.s32 3, %v160_v8 }
  0x17   :  { %531 = vmatprep.subr.bf16.mxu0 %v831_v21 }
  0x18   :  { %v162_v14 = vrot.slane %v157_v11, %v161_v9  ;;  %v170_v15 = vrot.slane %v157_v11, %v169_v10  ;;  %v166_v16 = vrot.slane %v157_v11, %v165_v12  ;;  %v174_v17 = vrot.slane %v157_v11, %v173_v13 }
  0x19   :  { %493 = vmatpush1.bf16.msra.mxu1 %v838_v25 }
  0x1a   :  { %532 = vmatpush1.bf16.msra.mxu0 %v829_v24  ;;  %494 = vmatprep.subr.bf16.mxu1 %v839_v27 }
  0x1b   :  { %533 = vmatprep.subr.bf16.mxu0 %v837_v26 }
  0x1d   :  { %495 = vmatpush1.bf16.msra.mxu1 %v844_v31 }
  0x1e   :  { %534 = vmatpush1.bf16.msra.mxu0 %v835_v28  ;;  %496 = vmatprep.subr.bf16.mxu1 %v845_v32 }
  0x1f   :  { %535 = vmatprep.subr.bf16.mxu0 %v843_v29 }
  0x21   :  { %497 = vmatpush1.bf16.msra.mxu1 %v850_v35  ;;  %v177_v35 = vsub.s32 4, %v160_v8 }
  0x22   :  { %536 = vmatpush1.bf16.msra.mxu0 %v841_v30  ;;  %564 = vmatprep.subr.bf16.mxu1 %v853_v36  ;;  %v185_v36 = vsub.s32 6, %v160_v8 }
  0x23   :  { %537 = vmatprep.subr.bf16.mxu0 %v849_v33 }
  0x26   :  { %538 = vmatpush1.bf16.msra.mxu0 %v847_v34 }
  0x27   :  { %778 = vmatprep.subr.bf16.mxu0 %v897_v0 }
  0xdc   :  { %v83_v39 = vpop.f32.mrb[0].mxu0 }
  0xdd   :  { %v84_v40 = vadd.f32 %v690_v38, %v83_v39  ;;  %v776_v41 = vpop.f32.mrb[1].mxu0  ;;  %v178_v38 = vrot.slane %v157_v11, %v177_v35  ;;  %v186_v39 = vrot.slane %v157_v11, %v185_v36 }
  0xde   :  { %v86_v42 = vpop.f32.mrb[2].mxu0 }
  0xdf   :  { %vm89_vm2 = vcmp.gt.f32.partialorder %v84_v40, 0.0  ;;  %v90_v43 = vmul.f32 0.2, %v84_v40  ;;  %v777_v44 = vpop.f32.mrb[3].mxu0 }
  0xe1   :  { %v91_v45 = vsel %vm89_vm2, %v84_v40, %v90_v43 }
  0xe2   :  { %v92_v48 = vpack.c.bf16 %v91_v45, %v91_v45 }
  0xe4   :  { %515 = vmatmul.mubr.bf16.vlgmr.msra.gmra.mrb[0].mxu1 %v92_v48  ;;  %556 = vmatmul.mubr.bf16.vlgmr.msra.gmra.mrb[4].mxu0 %v92_v48 }
  0xe5   :  { %565 = vmatpush1.bf16.msra.mxu1 %v851_v46  ;;  %779 = vmatpush3.bf16.msra.mxu0 %v854_v47 }
  0xe6   :  { %566 = vmatprep.subr.bf16.mxu1 %v857_v49  ;;  %780 = vmatprep.subr.bf16.mxu0 %v897_v0 }
  0xe7   :  { %596 = vmatprep.mubr.bf16.mxu1 %v899_v37  ;;  %794 = vmatprep.mubr.msk.bf16.mxu0 %vm898_vm0, %v897_v0  ;;  %v181_v37 = vsub.s32 5, %v160_v8 }
  0xe9   :  { %567 = vmatpush1.bf16.msra.mxu1 %v855_v50  ;;  %781 = vmatpush3.bf16.msra.mxu0 %v858_v51  ;;  %v182_v40 = vrot.slane %v157_v11, %v181_v37 }
  0xea   :  { %568 = vmatprep.subr.bf16.mxu1 %v861_v52  ;;  %782 = vmatprep.subr.bf16.mxu0 %v897_v0 }
  0xed   :  { %569 = vmatpush1.bf16.msra.mxu1 %v859_v53  ;;  %783 = vmatpush3.bf16.msra.mxu0 %v862_v54 }
  0xee   :  { %570 = vmatprep.subr.bf16.mxu1 %v865_v55  ;;  %784 = vmatprep.subr.bf16.mxu0 %v897_v0 }
  0xf1   :  { %571 = vmatpush1.bf16.msra.mxu1 %v863_v56  ;;  %785 = vmatpush3.bf16.msra.mxu0 %v866_v57 }
  0xf2   :  { %572 = vmatprep.subr.bf16.mxu1 %v869_v58  ;;  %786 = vmatprep.subr.bf16.mxu0 %v897_v0 }
  0xf5   :  { %573 = vmatpush1.bf16.msra.mxu1 %v867_v59  ;;  %787 = vmatpush3.bf16.msra.mxu0 %v870_v60 }
  0xf6   :  { %574 = vmatprep.subr.bf16.mxu1 %v873_v61  ;;  %788 = vmatprep.subr.bf16.mxu0 %v897_v0 }
  0xf9   :  { %575 = vmatpush1.bf16.msra.mxu1 %v871_v62  ;;  %789 = vmatpush3.bf16.msra.mxu0 %v874_v63 }
  0xfa   :  { %576 = vmatprep.subr.bf16.mxu1 %v877_v1  ;;  %790 = vmatprep.subr.bf16.mxu0 %v897_v0 }
  0xfd   :  { %577 = vmatpush1.bf16.msra.mxu1 %v875_v2  ;;  %791 = vmatpush3.bf16.msra.mxu0 %v878_v3 }
  0xfe   :  { %578 = vmatprep.subr.bf16.mxu1 %v881_v4  ;;  %792 = vmatprep.subr.bf16.mxu0 %v897_v0 }
 0x101   :  { %579 = vmatpush1.bf16.msra.mxu1 %v879_v5  ;;  %793 = vmatpush3.bf16.msra.mxu0 %v882_v6 }
 0x104   :  { %597 = vmatmul.mubr.bf16.vlgmr.msra.gmra.mrb[4].mxu1 %v92_v48  ;;  %795 = vmatmul.mubr.bf16.vlgmr.msra.gmra.mrb[8].mxu0 %v92_v48 }
 0x1b7   :  { %v516_v18 = vpop.f32.mrb[0].mxu1  ;;  %v557_v0 = vpop.f32.mrb[4].mxu0 }
 0x1b8   :  { %v517_v19 = vadd.f32 %v516_v18, %v162_v14  ;;  %v558_v20 = vadd.f32 %v557_v0, %v170_v15  ;;  %v518_v21 = vpop.f32.mrb[1].mxu1  ;;  %v559_v22 = vpop.f32.mrb[5].mxu0 }
 0x1b9   :  { %v519_v23 = vadd.f32 %v518_v21, %v166_v16  ;;  %v560_v24 = vadd.f32 %v559_v22, %v174_v17  ;;  %v520_v25 = vpop.f32.mrb[2].mxu1  ;;  %v561_v26 = vpop.f32.mrb[6].mxu0 }
 0x1ba   :  { %883 = vtanh.f32 %v517_v19  ;;  %v521_v27 = vpop.f32.mrb[3].mxu1  ;;  %v562_v28 = vpop.f32.mrb[7].mxu0 }
 0x1bb   :  { %885 = vtanh.f32 %v558_v20 }
 0x1bc   :  { %887 = vtanh.f32 %v519_v23 }
 0x1bd   :  { %889 = vtanh.f32 %v560_v24 }
 0x1c4   :  { %v884_v29 = vpop.eup %883 }
 0x1c5   :  { %v886_v30 = vpop.eup %885 }
 0x1c6   :  { %v888_v31 = vpop.eup %887 }
 0x1c7   :  { %v890_v32 = vpop.eup %889  ;;  %v754_v33 = vpack.c.bf16 %v888_v31, %v884_v29 }
 0x1c8   :  { %v755_v34 = vpack.c.bf16 %v890_v32, %v886_v30 }
 0x1c9   :  { %681 = vst [vmem:[%s1144_s5] sm:$0xff] %v754_v33 }
 0x1ca   :  { %682 = vst [vmem:[%s1144_s5 + $0x8] sm:$0xff] %v755_v34 }
 0x1d7   :  { %v598_v41 = vpop.f32.mrb[4].mxu1  ;;  %v639_v42 = vpop.f32.mrb[8].mxu0 }
 0x1d8   :  { %v599_v43 = vadd.f32 %v598_v41, %v178_v38  ;;  %v640_v44 = vadd.f32 %v639_v42, %v186_v39  ;;  %v600_v45 = vpop.f32.mrb[5].mxu1  ;;  %v796_v46 = vpop.f32.mrb[9].mxu0 }
 0x1d9   :  { %v601_v47 = vadd.f32 %v600_v45, %v182_v40  ;;  %v602_v48 = vpop.f32.mrb[6].mxu1  ;;  %v642_v49 = vpop.f32.mrb[10].mxu0 }
 0x1da   :  { %891 = vtanh.f32 %v599_v43  ;;  %v603_v50 = vpop.f32.mrb[7].mxu1  ;;  %v797_v51 = vpop.f32.mrb[11].mxu0 }
 0x1db   :  { %893 = vtanh.f32 %v640_v44 }
 0x1dc   :  { %895 = vtanh.f32 %v601_v47 }
 0x1e4   :  { %v892_v52 = vpop.eup %891 }
 0x1e5   :  { %v894_v53 = vpop.eup %893 }
 0x1e6   :  { %v896_v54 = vpop.eup %895  ;;  %v757_v55 = vpack.c.bf16 %v894_v53, %v894_v53 }
 0x1e7   :  { %v756_v56 = vpack.c.bf16 %v896_v54, %v892_v52 }
 0x1e8   :  { %685 = vst.msk [vmem:[%s1144_s5 + $0x18] sm:$0xf] %vm684_vm3, %v757_v55 }
 0x1e9   :  { %683 = vst [vmem:[%s1144_s5 + $0x10] sm:$0xff] %v756_v56 }

</bundles_post_ra>
